<compile_context>
chip_gen: v7x
topology: tpu7x:2x2x1
jax: 0.10.0
libtpu: 0.0.40
codegen_flags: <defaults>
</compile_context>

<pallas_src>
import functools

import jax
import jax.numpy as jnp
import numpy as np
from jax.experimental import pallas as pl
from jax.experimental.pallas import tpu as pltpu


def _round_up(x, m):
    return ((x + m - 1) // m) * m


# ---------------------------------------------------------------------------
# Pallas kernel: everything after the embedding lookups.
#
# feat_ref : (tb, FPAD)  lanes [0:2E)=user|cand feats, [2E:2E+L)=seq_sum,
#                        [2E+L:2E+L+K*L)=routing bias with seq mask folded in.
# w_ref    : (RTOT, NPAD) rows [0:CATW) fused wu/wl/wc + bias row (block layout),
#                         rows [CATW:CATW+RF) final linear wf + bf row,
#                         row SROW = sum_l S[l, :].
# out_ref  : (tb, NPAD)  lane-dense logits (wrapper slices to NSHOP).
# ---------------------------------------------------------------------------
def mind_kernel(p, K, L, E, OU, CATW, RF, SROW,
                feat_ref, w_ref, out_ref):
    TB = feat_ref.shape[0]
    KOU = K * OU
    UC0, SEQ0, B0 = 0, 2 * E, 2 * E + L

    feat = feat_ref[...]                                    # (TB, FPAD)
    uc_feat = feat[:, UC0:UC0 + 2 * E]                      # (TB, 2E)  [user | cand]
    seq_sum = feat[:, SEQ0:SEQ0 + L]                        # (TB, L)
    bias = feat[:, B0:B0 + K * L]                           # (TB, K*L)
    s_row = w_ref[SROW:SROW + 1, 0:OU]                      # (1, OU)   sum_l S[l, :]

    ones_col = jnp.ones((TB, 1), jnp.float32)
    cat_pad = CATW - 2 * E - OU - 1                         # zero fill up to CATW

    if K == 1:
        # ---- routing softmax over L (mask pre-folded as additive bias) ----------
        b_max = jnp.max(bias, axis=-1, keepdims=True)
        ew = jnp.exp(bias - b_max)                          # (TB, L)
        # exact divide: (TB,1)-wide, off the critical path; keeps the 1e-4 check.
        t = (jnp.sum(ew * seq_sum, axis=-1, keepdims=True)
             / jnp.sum(ew, axis=-1, keepdims=True))         # (TB, 1)

        # ---- factorized bilinear + squash (K == 1: capsule norm is elementwise) --
        high_tmp = t * s_row                                # (TB, OU)
        sq = high_tmp * high_tmp
        high = sq / (1.0 + sq) * jax.lax.rsqrt(sq + 1e-9) * high_tmp

        # ---- fused [user + capsule + bias | label] linear in ONE MXU dot ---------
        # wu (rows 0:E) and wc (rows 2E:2E+OU) share output columns 0:OU, and the
        # constant-1 column hits the bias row, so fused[:, 0:OU] = caps + user + bu + bc.
        pieces = [uc_feat, high, ones_col]
        if cat_pad > 0:
            pieces.append(jnp.zeros((TB, cat_pad), jnp.float32))
        cat = jnp.concatenate(pieces, axis=-1)              # (TB, CATW)
        fused = jnp.dot(cat, w_ref[0:CATW, :],
                        preferred_element_type=jnp.float32)  # (TB, NPAD)
        x = jnp.maximum(fused[:, 0:OU], 0.0)                 # (TB, OU)

        # label-aware attention softmax over a single capsule is identically 1.0,
        # so att == x (the label branch is dead for K == 1).
        att = x                                              # (TB, KOU)
    else:
        # ---- generic multi-capsule path (not exercised by the shipped K == 1) ----
        bias3 = bias.reshape(TB, K, L)
        b_max = jnp.max(bias3, axis=-1, keepdims=True)
        ew = jnp.exp(bias3 - b_max)
        w = ew / jnp.sum(ew, axis=-1, keepdims=True)                       # (TB, K, L)
        t = jnp.sum(w * seq_sum[:, None, :], axis=-1)                      # (TB, K)
        high_tmp = t[:, :, None] * s_row[None, :, :]                       # (TB, K, OU)
        sq = jnp.sum(high_tmp * high_tmp, axis=1, keepdims=True)           # (TB, 1, OU)
        high = sq / (1.0 + sq) * jax.lax.rsqrt(sq + 1e-9) * high_tmp       # (TB, K, OU)

        # fused user/label dot (the high columns are zeroed so the shared wc rows
        # contribute nothing here); capsule linear done per-capsule separately.
        pieces = [uc_feat, jnp.zeros((TB, OU), jnp.float32), ones_col]
        if cat_pad > 0:
            pieces.append(jnp.zeros((TB, cat_pad), jnp.float32))
        cat = jnp.concatenate(pieces, axis=-1)                             # (TB, CATW)
        ul = jnp.dot(cat, w_ref[0:CATW, :], preferred_element_type=jnp.float32)
        user_b = ul[:, 0:OU]                                               # user + bu + bc
        label = ul[:, OU:2 * OU]                                           # label + bl

        wc = w_ref[2 * E:2 * E + OU, 0:OU]                                 # (OU, OU)
        caps = jnp.dot(high.reshape(TB * K, OU), wc,
                       preferred_element_type=jnp.float32).reshape(TB, K, OU)
        x = jnp.maximum(caps + user_b[:, None, :], 0.0)                    # (TB, K, OU)

        xl = x * label[:, None, :]
        powed = xl * xl if p == 2 else xl ** p       # only p == 2 is sign-safe
        aw = jnp.sum(powed, axis=-1)                                       # (TB, K)
        aw_max = jnp.max(aw, axis=-1, keepdims=True)
        e2 = jnp.exp(aw - aw_max)
        aw = e2 / jnp.sum(e2, axis=-1, keepdims=True)
        att = (x * aw[:, :, None]).reshape(TB, KOU)

    # ---- final linear: bias folded in via a constant-1 contraction column --------
    tail = RF - KOU - 1
    pieces = [att, ones_col]
    if tail > 0:
        pieces.append(jnp.zeros((TB, tail), jnp.float32))
    att_ext = jnp.concatenate(pieces, axis=-1)               # (TB, RF)
    out_ref[...] = jnp.dot(att_ext, w_ref[CATW:CATW + RF, :],
                           preferred_element_type=jnp.float32)


# ---------------------------------------------------------------------------
# Wrapper: embedding gathers (glue), slab packing + pallas_call.
# ---------------------------------------------------------------------------
def mind_forward(params, sex, level, shop_seq, cate_seq, floor_seq,
                 cand_shop, cand_cate, *, p=2, tb=64):
    B, L = shop_seq.shape
    K = params["B_matrix"].shape[0]
    E = params["E_shop"].shape[1]
    OU = params["S"].shape[1]
    NSHOP = params["wf"].shape[1]
    KOU = K * OU

    tb = max(8, min(tb, B))
    assert B % tb == 0, "batch must be divisible by the batch tile"
    grid = (B // tb,)

    # ---- embedding gathers (plain JAX glue) --------------------------------------
    # Only sum_E(seq_embed) is consumed by routing -> gather 1-D per-table row-sums.
    shop_rs = jnp.sum(params["E_shop"], axis=-1)
    cate_rs = jnp.sum(params["E_cate"], axis=-1)
    floor_rs = jnp.sum(params["E_floor"], axis=-1)
    seq_sum = (shop_rs[shop_seq] + cate_rs[cate_seq]
               + floor_rs[floor_seq]).astype(jnp.float32)                   # (B, L)
    user_feat = (params["E_sex"][sex] + params["E_level"][level]).astype(jnp.float32)
    cand_feat = (params["E_cate"][cand_cate]
                 + params["E_shop"][cand_shop]).astype(jnp.float32)         # (B, E)

    # ---- sequence-length mask folded into B_matrix as an additive bias ----------
    # (rows with seq_len == 0 degenerate to a uniform softmax over padding, exactly
    #  like the PyTorch reference.)
    seq_lens = jnp.sum(shop_seq != 0, axis=1, dtype=jnp.int32)              # (B,)
    valid = jnp.arange(L, dtype=jnp.int32)[None, :] < seq_lens[:, None]     # (B, L)
    pad = jnp.float32(-2 ** 16 + 1)
    bias_kl = jnp.where(valid[:, None, :],
                        params["B_matrix"][None, :, :].astype(jnp.float32),
                        pad)                                                # (B, K, L)

    # ---- single lane-dense per-batch slab ----------------------------------------
    FUSE_W = 2 * E + L + K * L
    FPAD = _round_up(max(FUSE_W, 128), 128)
    feat_parts = [user_feat, cand_feat, seq_sum, bias_kl.reshape(B, K * L)]
    if FPAD > FUSE_W:
        feat_parts.append(jnp.zeros((B, FPAD - FUSE_W), jnp.float32))
    feat_slab = jnp.concatenate(feat_parts, axis=-1)                        # (B, FPAD)

    # ---- single weight/bias slab ---------------------------------------------------
    CATW = _round_up(2 * E + OU + 1, 8)      # fused-linear contraction width
    RF = _round_up(KOU + 1, 8)               # final-linear contraction width
    SROW = CATW + RF                         # row holding sum_l S[l, :]
    RTOT = _round_up(SROW + 1, 8)
    NPAD = _round_up(NSHOP, 128)             # lane-dense output width
    assert 2 * OU <= NPAD

    b_cu = (params["bu"] + params["bc"]).reshape(OU)      # fused user+capsule bias
    bl = params["bl"].reshape(OU)
    s_col = jnp.sum(params["S"], axis=0)

    w_slab = jnp.zeros((RTOT, NPAD), jnp.float32)
    w_slab = w_slab.at[0:E, 0:OU].set(params["wu"])                   # user linear
    w_slab = w_slab.at[E:2 * E, OU:2 * OU].set(params["wl"])          # label linear
    w_slab = w_slab.at[2 * E:2 * E + OU, 0:OU].set(params["wc"])      # capsule linear
    w_slab = w_slab.at[2 * E + OU, 0:OU].set(b_cu)                    # bu + bc
    w_slab = w_slab.at[2 * E + OU, OU:2 * OU].set(bl)                 # bl
    w_slab = w_slab.at[CATW:CATW + KOU, 0:NSHOP].set(params["wf"])    # final linear
    w_slab = w_slab.at[CATW + KOU, 0:NSHOP].set(params["bf"].reshape(NSHOP))
    w_slab = w_slab.at[SROW, 0:OU].set(s_col)                         # sum_l S[l, :]

    # TODO(synk): for large K/L configs, pass seq_lens via PrefetchScalarGridSpec and
    # build the routing bias in-kernel with broadcasted_iota instead of shipping the
    # (B, K*L) bias lanes; marginal at K=1, L=4.
    out_pad = pl.pallas_call(
        functools.partial(mind_kernel, p, K, L, E, OU, CATW, RF, SROW),
        out_shape=jax.ShapeDtypeStruct((B, NPAD), jnp.float32),
        grid=grid,
        in_specs=[
            pl.BlockSpec((tb, FPAD), lambda i: (i, 0)),      # packed per-batch slab
            pl.BlockSpec((RTOT, NPAD), lambda i: (0, 0)),    # packed weight slab
        ],
        out_specs=pl.BlockSpec((tb, NPAD), lambda i: (i, 0)),
        compiler_params=pltpu.CompilerParams(dimension_semantics=("parallel",)),
    )(feat_slab, w_slab)

    return out_pad[:, :NSHOP]


# ---------------------------------------------------------------------------
# Pure-JAX reference (mirrors the PyTorch forward exactly) for verification.
# ---------------------------------------------------------------------------
def mind_reference(params, sex, level, shop_seq, cate_seq, floor_seq,
                   cand_shop, cand_cate, *, p=2):
    B, L = shop_seq.shape
    K = params["B_matrix"].shape[0]
    OU = params["S"].shape[1]

    seq_lens = jnp.sum(shop_seq != 0, axis=1).reshape(B, 1)
    seq_embed = (params["E_shop"][shop_seq] + params["E_floor"][floor_seq]
                 + params["E_cate"][cate_seq])
    user_other = (params["E_sex"][sex] + params["E_level"][level])[:, None, :]  # (B,1,E)
    cand_feat = params["E_cate"][cand_cate] + params["E_shop"][cand_shop]

    user_emb = user_other @ params["wu"] + params["bu"]                  # (B,1,OU)
    label_emb = cand_feat @ params["wl"] + params["bl"]                  # (B,OU)

    # Routing (iteration = 1)
    mask = jnp.arange(L)[None, None, :] < seq_lens[:, :, None]           # (B,1,L)
    mask = jnp.broadcast_to(mask, (B, K, L))
    pad = jnp.full((B, K, L), -2.0 ** 16 + 1, jnp.float32)
    b_tile = jnp.broadcast_to(params["B_matrix"][None], (B, K, L))
    w = jax.nn.softmax(jnp.where(mask, b_tile, pad), axis=-1)
    low_new = jnp.sum(seq_embed, -1, keepdims=True) * jnp.sum(params["S"], 0)[None, None, :]
    high_tmp = w @ low_new                                               # (B,K,OU)
    sq = jnp.sum(high_tmp ** 2, axis=1, keepdims=True)
    high = sq / (1 + sq) / jnp.sqrt(sq + 1e-9) * high_tmp

    caps = high @ params["wc"] + params["bc"]                            # (B,K,OU)
    x = jax.nn.relu(caps + user_emb)
    pos_label = label_emb[:, None, :]
    aw = jnp.sum((x * jnp.tile(pos_label, (1, K, 1))) ** p, axis=-1)
    aw = jax.nn.softmax(aw, axis=1)
    att = (x * aw[:, :, None]).reshape(B, -1)
    return att @ params["wf"] + params["bf"]


# ---------------------------------------------------------------------------
# Deterministic parameter / input construction.
# ---------------------------------------------------------------------------
def make_params(key, feature_size, E=8, IU=4, OU=8, K=1, L=4, n_shop_dict=15):
    ks = jax.random.split(key, 16)
    NSHOP = n_shop_dict + 1

    def emb(k, n, pad0=False):
        w = jax.random.normal(k, (n, E), jnp.float32)
        if pad0:
            w = w.at[0].set(0.0)          # padding_idx=0
        return w

    def lin(k, din, dout):
        kw, kb = jax.random.split(k)
        return (jax.random.normal(kw, (din, dout), jnp.float32) * 0.1,
                jax.random.normal(kb, (1, dout), jnp.float32) * 0.01)

    wu, bu = lin(ks[5], E, OU)
    wl, bl = lin(ks[6], E, OU)
    wc, bc = lin(ks[7], E, OU)
    wf, bf = lin(ks[8], K * OU, NSHOP)

    # TODO(synk): the reference re-draws B_matrix with nn.init.normal_ on every
    # forward (non-deterministic); here it is a fixed deterministic parameter.
    return dict(
        E_sex=emb(ks[0], feature_size[0]),
        E_level=emb(ks[1], feature_size[1]),
        E_shop=emb(ks[2], feature_size[2] + 1, pad0=True),
        E_cate=emb(ks[3], feature_size[3] + 1, pad0=True),
        E_floor=emb(ks[4], feature_size[4] + 1, pad0=True),
        S=jax.random.normal(ks[9], (IU, OU), jnp.float32),
        B_matrix=jax.random.normal(ks[10], (K, L), jnp.float32),
        wu=wu, bu=bu, wl=wl, bl=bl, wc=wc, bc=bc,
        wf=wf, bf=bf,
    )


if __name__ == "__main__":
    B, L, E, IU, OU, K, P = 256, 4, 8, 4, 8, 1, 2
    TB = 64                                   # 4 grid steps -> 2 per TensorCore on v7x
    feature_size = [3, 5, 15, 10, 6]          # sex, level, shop, cate, floor vocab sizes
    key = jax.random.PRNGKey(0)
    kp, kd = jax.random.split(key)
    params = make_params(kp, feature_size, E=E, IU=IU, OU=OU, K=K, L=L, n_shop_dict=15)

    kds = jax.random.split(kd, 8)
    sex = jax.random.randint(kds[0], (B,), 0, feature_size[0])
    level = jax.random.randint(kds[1], (B,), 0, feature_size[1])
    shop_seq = jax.random.randint(kds[2], (B, L), 1, feature_size[2] + 1)
    cate_seq = jax.random.randint(kds[3], (B, L), 1, feature_size[3] + 1)
    floor_seq = jax.random.randint(kds[4], (B, L), 1, feature_size[4] + 1)
    cand_shop = jax.random.randint(kds[5], (B,), 1, feature_size[2] + 1)
    cand_cate = jax.random.randint(kds[6], (B,), 1, feature_size[3] + 1)

    # Variable-length sequences, zero-padded at the tail.  The reference model
    # requires max(seq_len) == L (otherwise its W @ low_capsule matmul fails),
    # so row 0 is kept at full length.
    lengths = jax.random.randint(kds[7], (B,), 1, L + 1).at[0].set(L)
    valid = jnp.arange(L)[None, :] < lengths[:, None]
    shop_seq = jnp.where(valid, shop_seq, 0)
    cate_seq = jnp.where(valid, cate_seq, 0)
    floor_seq = jnp.where(valid, floor_seq, 0)

    out = mind_forward(params, sex, level, shop_seq, cate_seq, floor_seq,
                       cand_shop, cand_cate, p=P, tb=TB)
    out = jax.block_until_ready(out)

    ref = mind_reference(params, sex, level, shop_seq, cate_seq, floor_seq,
                         cand_shop, cand_cate, p=P)
    np.testing.assert_allclose(np.asarray(out), np.asarray(ref), rtol=1e-4, atol=1e-4)

    print("KERNEL_OK")
</pallas_src>

<mosaic_0001>
module attributes {stable_mosaic.version = 11 : i64} {
  func.func @mind_kernel(%arg0: i32, %arg1: memref<64x128xf32, #tpu.memory_space<vmem>>, %arg2: memref<56x128xf32, #tpu.memory_space<vmem>>, %arg3: memref<64x128xf32, #tpu.memory_space<vmem>>) attributes {dimension_semantics = [#tpu.dimension_semantics<parallel>], iteration_bounds = array<i64: 4>, scalar_prefetch = 0 : i64, scratch_operands = 0 : i64, tpu.core_type = #tpu.core_type<tc>, window_params = [{transform_indices = @transform_0, window_bounds = array<i64: 64, 128>}, {pipeline_mode = #tpu.pipeline_mode<synchronous>, transform_indices = @transform_1, window_bounds = array<i64: 56, 128>}, {transform_indices = @transform_2, window_bounds = array<i64: 64, 128>}]} {
    %c0 = arith.constant 0 : index
    %c0_0 = arith.constant 0 : index
    %0 = vector.load %arg1[%c0, %c0_0] : memref<64x128xf32, #tpu.memory_space<vmem>>, vector<64x128xf32>
    %1 = vector.extract_strided_slice %0 {offsets = [0, 0], sizes = [64, 16], strides = [1, 1]} : vector<64x128xf32> to vector<64x16xf32>
    %2 = vector.extract_strided_slice %0 {offsets = [0, 16], sizes = [64, 4], strides = [1, 1]} : vector<64x128xf32> to vector<64x4xf32>
    %3 = vector.extract_strided_slice %0 {offsets = [0, 20], sizes = [64, 4], strides = [1, 1]} : vector<64x128xf32> to vector<64x4xf32>
    %c48 = arith.constant 48 : index
    %c0_1 = arith.constant 0 : index
    %4 = vector.load %arg2[%c48, %c0_1] : memref<56x128xf32, #tpu.memory_space<vmem>>, vector<1x8xf32>
    %cst = arith.constant 1.000000e+00 : f32
    %5 = vector.broadcast %cst : f32 to vector<64x1xf32>
    %cst_2 = arith.constant dense<0xFF800000> : vector<64xf32>
    %6 = vector.multi_reduction <maximumf>, %3, %cst_2 [1] : vector<64x4xf32> to vector<64xf32>
    %7 = vector.shape_cast %6 : vector<64xf32> to vector<64x1xf32>
    %8 = vector.broadcast %7 : vector<64x1xf32> to vector<64x4xf32>
    %9 = arith.subf %3, %8 : vector<64x4xf32>
    %10 = math.exp %9 : vector<64x4xf32>
    %11 = arith.mulf %10, %2 : vector<64x4xf32>
    %cst_3 = arith.constant dense<0.000000e+00> : vector<64xf32>
    %12 = vector.multi_reduction <add>, %11, %cst_3 [1] : vector<64x4xf32> to vector<64xf32>
    %13 = vector.shape_cast %12 : vector<64xf32> to vector<64x1xf32>
    %cst_4 = arith.constant dense<0.000000e+00> : vector<64xf32>
    %14 = vector.multi_reduction <add>, %10, %cst_4 [1] : vector<64x4xf32> to vector<64xf32>
    %15 = vector.shape_cast %14 : vector<64xf32> to vector<64x1xf32>
    %16 = arith.divf %13, %15 : vector<64x1xf32>
    %17 = vector.broadcast %16 : vector<64x1xf32> to vector<64x8xf32>
    %18 = vector.broadcast %4 : vector<1x8xf32> to vector<64x8xf32>
    %19 = arith.mulf %17, %18 : vector<64x8xf32>
    %20 = arith.mulf %19, %19 : vector<64x8xf32>
    %cst_5 = arith.constant 1.000000e+00 : f32
    %21 = vector.broadcast %cst_5 : f32 to vector<64x8xf32>
    %22 = arith.addf %21, %20 : vector<64x8xf32>
    %23 = arith.divf %20, %22 : vector<64x8xf32>
    %cst_6 = arith.constant 9.99999971E-10 : f32
    %24 = vector.broadcast %cst_6 : f32 to vector<64x8xf32>
    %25 = arith.addf %20, %24 : vector<64x8xf32>
    %26 = math.rsqrt %25 : vector<64x8xf32>
    %27 = arith.mulf %23, %26 : vector<64x8xf32>
    %28 = arith.mulf %27, %19 : vector<64x8xf32>
    %cst_7 = arith.constant 0.000000e+00 : f32
    %29 = vector.broadcast %cst_7 : f32 to vector<64x7xf32>
    %30 = tpu.concatenate %1, %28, %5, %29 in 1 : vector<64x16xf32>, vector<64x8xf32>, vector<64x1xf32>, vector<64x7xf32> -> vector<64x32xf32>
    %c0_8 = arith.constant 0 : index
    %c0_9 = arith.constant 0 : index
    %31 = vector.load %arg2[%c0_8, %c0_9] : memref<56x128xf32, #tpu.memory_space<vmem>>, vector<32x128xf32>
    %cst_10 = arith.constant dense<0.000000e+00> : vector<64x128xf32>
    %32 = tpu.matmul %30, %31, %cst_10 {dimension_numbers = #tpu.dot_dimension_numbers<[1], [0], [0], [1], [0, 0, 1, 1], [], []>} : vector<64x32xf32>, vector<32x128xf32>, vector<64x128xf32> -> vector<64x128xf32>
    %33 = vector.extract_strided_slice %32 {offsets = [0, 0], sizes = [64, 8], strides = [1, 1]} : vector<64x128xf32> to vector<64x8xf32>
    %cst_11 = arith.constant 0.000000e+00 : f32
    %34 = vector.broadcast %cst_11 : f32 to vector<64x8xf32>
    %35 = arith.maximumf %33, %34 : vector<64x8xf32>
    %cst_12 = arith.constant 0.000000e+00 : f32
    %36 = vector.broadcast %cst_12 : f32 to vector<64x7xf32>
    %37 = tpu.concatenate %35, %5, %36 in 1 : vector<64x8xf32>, vector<64x1xf32>, vector<64x7xf32> -> vector<64x16xf32>
    %c32 = arith.constant 32 : index
    %c0_13 = arith.constant 0 : index
    %38 = vector.load %arg2[%c32, %c0_13] : memref<56x128xf32, #tpu.memory_space<vmem>>, vector<16x128xf32>
    %cst_14 = arith.constant dense<0.000000e+00> : vector<64x128xf32>
    %39 = tpu.matmul %37, %38, %cst_14 {dimension_numbers = #tpu.dot_dimension_numbers<[1], [0], [0], [1], [0, 0, 1, 1], [], []>} : vector<64x16xf32>, vector<16x128xf32>, vector<64x128xf32> -> vector<64x128xf32>
    %c0_15 = arith.constant 0 : index
    %c0_16 = arith.constant 0 : index
    %40 = vector.load %arg3[%c0_15, %c0_16] : memref<64x128xf32, #tpu.memory_space<vmem>>, vector<64x128xf32>
    tpu.vector_store %arg3[%c0_15, %c0_16], %39 {strides = array<i32>} : memref<64x128xf32, #tpu.memory_space<vmem>>, vector<64x128xf32>,
    return
  }
  func.func @transform_0(%arg0: i32) -> (i32, i32) {
    %c0_i32 = arith.constant 0 : i32
    %c0_i32_0 = arith.constant 0 : i32
    return %arg0, %c0_i32 : i32, i32
  }
  func.func @transform_1(%arg0: i32) -> (i32, i32) {
    %c0_i32 = arith.constant 0 : i32
    %c0_i32_0 = arith.constant 0 : i32
    %c0_i32_1 = arith.constant 0 : i32
    return %c0_i32, %c0_i32_0 : i32, i32
  }
  func.func @transform_2(%arg0: i32) -> (i32, i32) {
    %c0_i32 = arith.constant 0 : i32
    %c0_i32_0 = arith.constant 0 : i32
    return %arg0, %c0_i32 : i32, i32
  }
}

</mosaic_0001>

<bundles_post_ra>
// kernel: tpu_custom_call.1
= control target key start
LH: loop header
LB: loop body
LE: loop exit
PB: predicated region body
PF: predicated region fallthrough
CT: control target
= control target key end

     0   :  { %7 = vsyncpa [#allocation3], 0  ;;  %s1724_s0 = inlined_call_operand.hbm [shape: f32[256,128], index: 0, kind: input, shape index: {}]   ;;  %s1725_s1 = inlined_call_operand.hbm [shape: f32[56,128], index: 1, kind: input, shape index: {}]   ;;  %s1726_s2 = inlined_call_operand.hbm [shape: f32[256,128], index: 2, kind: output, shape index: {}]  }
   0x1   :  { %9 = vsyncpa [#allocation3 + $0x1], 0 }
   0x2   :  { %10 = vsyncpa [#allocation6], 0 }
   0x3   :  { %11 = vsyncpa [#allocation4], 0 }
   0x4   :  { %13 = vsyncpa [#allocation4 + $0x1], 0  ;;  %s1325_s9 = smov 0   ;;  %s1327_s10 = smov 0  }
   0x5   :  { %s1329_s11 = smov 0   ;;  %s1331_s12 = smov 0  }
   0x6 LB: > { %s1346_s13 = sadd.s32 4294967295, %s1298_s12   ;;  %s937_s14 = sadd.s32 4294967294, %s1298_s12   ;;  %s1298_s12 = sphi %s1331_s12, %s1745_s12   ;;  %s1294_s11 = sphi %s1329_s11, %s1744_s11   ;;  %s1290_s10 = sphi %s1327_s10, %s1743_s10   ;;  %s1286_s9 = sphi %s1325_s9, %s1742_s9  }
   0x7   : > { %p39_p0 = scmp.ne.s32.totalorder %s1290_s10, %s1286_s9  ;;  %p1727_p1 = scmp.eq.s32.totalorder %s1346_s13, 0 }
   0x8   : > { %p90_p3 = scmp.eq.s32.totalorder %s937_s14, 3  ;;  %p938_p5 = scmp.ge.s32.totalorder %s1298_s12, 1 }
   0x9   : > { %p1355_p4 = por %p1727_p1, %p39_p0  ;;  %p97_p7 = scmp.lt.s32.totalorder %s1298_s12, 5 }
   0xa   : > { %p1360_p6 = por %p90_p3, %p39_p0  ;;  %s1300_s18 = smov [#allocation5]  }
   0xb   : > { %s1730_s15 = scalar_select %p1355_p4, 1, 0 }
   0xc   : > { %s1731_s16 = scalar_select %p1360_p6, 1, 0 }
   0xd   : > { %p1365_p8 = pnand %p938_p5, %p97_p7  ;;  %s109_s19 = sshll.u32 %s1300_s18, 4  ;;  %s110_s19 = int_to_ptr.vmem [resolvable:$true] %s109_s19 }
   0xe   : > { %s1378_s21 = sadd.s32 1, %s1298_s12   ;;  %s26_s22 = sadd.s32 1, %s1294_s11 }
   0xf   : > { %s1732_s17 = scalar_select %p1365_p8, 1, 0 }
  0x10   : > { %p1050_p9 = pneg %p1365_p8  ;;  %s23_s23 = ssub.s32 %s1298_s12, %s1378_s21 }
  0x11   : > { %s1170_s26 = scalar_lea.hbm %s1725_s1, 896 }
  0x12   : > { %p1373_p10 = pnand %p1050_p9, %p1727_p1  ;;  %p1171_p11 = scmp.ne.s32.totalorder %s1725_s1, %s1170_s26 }
  0x13   : > { %p1177_p3 = scmp.lt.u32.totalorder %s1170_s26, %s1725_s1 }
  0x14   : > { %p1172_p12 = pneg %p1373_p10 }
  0x16   : > { %p1173_p13 = pnand %p1172_p12, %p1171_p11 }
  0x18   : > { %p1174_p0 = pneg %p1173_p13 }
  0x1a   : > { %p1179_p5 = pnand %p1177_p3, %p1174_p0 }
  0x1c   : > { %1182 = shalt.err (!%p1179_p5)
}
  0x1d   : > { %s1183_s3 = scalar_lea.vmem %s110_s19, 896  ;;  %p1191_p2 = scmp.lt.s32.totalorder %s110_s19, %s110_s19 }
  0x1e   : > { %p1184_p7 = scmp.ne.s32.totalorder %s110_s19, %s1183_s3  ;;  %p1192_p6 = scmp.lt.s32.totalorder %s1183_s3, %s1183_s3 }
  0x20   : > { %p1186_p9 = pnand %p1184_p7, %p1172_p12  ;;  %p1193_p4 = por %p1192_p6, %p1191_p2 }
  0x22   : > { %p1187_p1 = pneg %p1186_p9 }
  0x24   : > { %p1194_p8 = pnand %p1193_p4, %p1187_p1 }
  0x26   : > { %1197 = shalt.err (!%p1194_p8)
}
  0x27   : > { %s1301_s4 = smov 128   ;;  %s1302_s5 = smov 8  }
  0x28   : > { %1053 = dma.hbm_to_vmem [thread:$0]  (!%p1373_p10), %s1725_s1, 896, %s110_s19, [#allocation6], %s1301_s4, %s1301_s4, %s1302_s5  }
  0x29   : > { %p24_p1 = scmp.eq.s32.totalorder %s23_s23, 0  ;;  %p33_p2 = scmp.ne.s32.totalorder %s1294_s11, %s1290_s10 }
  0x2a   : > { %p34_p4 = scmp.eq.s32.totalorder %s1298_s12, 0  ;;  %p1063_p6 = scmp.lt.s32.totalorder %s1298_s12, 4 }
  0x2b   : > { %s1407_s8 = scalar_select %p24_p1, %s1294_s11, %s26_s22  }
  0x2c   : > { %p35_p8 = por %p34_p4, %p33_p2  ;;  %p1734_p11 = scmp.eq.s32.totalorder %s1346_s13, 3 }
  0x2d   : > { %s123_s18 = sand.u32 1, %s1294_s11   ;;  %s970_s20 = sshll.u32 %s1298_s12, 10 }
  0x2e   : > { %p1411_p12 = por %p1734_p11, %p33_p2  ;;  %s941_s24 = sshll.u32 %s123_s18, 6 }
  0x2f   : > { %s1420_s27 = scalar_lea.hbm %s1724_s0, %s970_s20  ;;  %s127_s19 = scalar_lea.vmem [#allocation2], %s941_s24 }
  0x30   : > { %s134_s22 = sshll.u32 %s127_s19, 4  ;;  %p1422_p10 = pnand %p1063_p6, %p35_p8  ;;  %s1426_s22 = int_to_ptr.vmem [resolvable:$true] %s134_s22 }
  0x31   : > { %s1428_s28 = scalar_lea.sflag [#allocation3], %s123_s18  ;;  %s1198_s29 = scalar_lea.hbm %s1420_s27, 1024 }
  0x32   : > { %p1199_p13 = scmp.ne.s32.totalorder %s1420_s27, %s1198_s29  ;;  %p1200_p0 = pneg %p1422_p10 }
  0x33   : > { %s1203_s6 = scalar_lea.hbm %s1724_s0, 4096  ;;  %p1204_p7 = scmp.lt.u32.totalorder %s1420_s27, %s1724_s0 }
  0x34   : > { %p1201_p3 = pnand %p1200_p0, %p1199_p13  ;;  %p1205_p9 = scmp.lt.u32.totalorder %s1203_s6, %s1198_s29 }
  0x35   : > { %p1207_p2 = scmp.lt.u32.totalorder %s1198_s29, %s1420_s27 }
  0x36   : > { %p1202_p5 = pneg %p1201_p3  ;;  %p1206_p1 = por %p1205_p9, %p1204_p7 }
  0x38   : > { %p1208_p4 = por %p1207_p2, %p1206_p1 }
  0x3a   : > { %p1209_p6 = pnand %p1208_p4, %p1202_p5 }
  0x3c   : > { %1212 = shalt.err (!%p1209_p6)
}
  0x3d   : > { %s1213_s18 = scalar_lea.vmem %s1426_s22, 1024  ;;  %s1303_s24 = smov [#allocation2]  }
  0x3e   : > { %p1214_p8 = scmp.ne.s32.totalorder %s1426_s22, %s1213_s18  ;;  %s1218_s25 = sshll.u32 %s1303_s24, 4  ;;  %s1219_s25 = int_to_ptr.vmem [resolvable:$false] %s1218_s25 }
  0x3f   : > { %s1220_s26 = scalar_lea.vmem %s1219_s25, 2048  ;;  %p1221_p3 = scmp.lt.s32.totalorder %s1426_s22, %s1219_s25 }
  0x40   : > { %p1216_p11 = pnand %p1214_p8, %p1200_p0  ;;  %p1222_p7 = scmp.lt.s32.totalorder %s1220_s26, %s1213_s18 }
  0x42   : > { %p1217_p13 = pneg %p1216_p11  ;;  %p1223_p9 = por %p1222_p7, %p1221_p3 }
  0x44   : > { %p1224_p1 = pnand %p1223_p9, %p1217_p13 }
  0x46   : > { %1227 = shalt.err (!%p1224_p1)
}
  0x47   : > { %1057 = dma.hbm_to_vmem [thread:$0]  (!%p1422_p10), %s1420_s27, 1024, %s1426_s22, %s1428_s28, %s1301_s4, %s1301_s4, %s1302_s5  }
  0x48   : > { %p1737_p0 = scmp.ne.s32.totalorder %s1732_s17, 0 }
  0x49   : > { %s1462_s19 = sand.u32 (!%p1737_p0), 1, %s1290_s10   ;;  %p1738_p5 = scmp.ne.s32.totalorder (!%p1737_p0), %s1730_s15, 0 }
  0x4a   : > { %146 = sbr.rel (%p1737_p0) target bundleno = 1129 (0x469), region = 28  ;;  %s945_s29 = sshll.u32 (!%p1737_p0), %s1462_s19, 6 }
  0x4b   : > { %s149_s30 = scalar_lea.sflag (!%p1737_p0), [#allocation3], %s1462_s19  ;;  %s152_s23 = scalar_lea.vmem (!%p1737_p0), [#allocation2], %s945_s29 }
  0x51   : > { %1273 = dma.done.wait (%p1738_p5), %s149_s30, 1024  }
  0x52   : > { %1275 = vsyncadd (%p1738_p5), %s149_s30, 4294966272  ;;  %p1739_p10 = scmp.eq.s32.totalorder %s1346_s13, 0 }
  0x54   : > { %1277 = dma.done.wait (%p1739_p10), [#allocation6], 896   ;;  %p1740_p2 = pmov %p1739_p10 }
  0x55   : > { %vm188_vm0 = vcmask 195744   ;;  %v1476_v0 = vld [vmem:[%s152_s23 + $0x10] sm:$0xff]  ;;  %v1478_v1 = vld [vmem:[%s152_s23] sm:$0xff]  ;;  %v1480_v2 = vld [vmem:[%s152_s23 + $0x18] sm:$0xff]  ;;  %s1304_s15 = smov 4   ;;  %s1305_s17 = smov 108  }
  0x56   : > { %1279 = vsyncadd (%p1740_p2), [#allocation6], 4294966400  ;;  %v195_v3 = vsel %vm188_vm0, %v1476_v0, -inf  ;;  %v189_v4 = vsel %vm188_vm0, %v1478_v1, -inf  ;;  %v1486_v5 = vld [vmem:[%s152_s23 + $0x8] sm:$0xff]  ;;  %v198_v6 = vsel %vm188_vm0, %v1480_v2, -inf }
  0x57   : > { %196 = vmax.xlane.f32.xlu1 %v195_v3  ;;  %190 = vmax.xlane.f32.xlu0 %v189_v4  ;;  %v192_v7 = vsel %vm188_vm0, %v1486_v5, -inf  ;;  %v1492_v8 = vld [vmem:[%s152_s23 + $0x28] sm:$0xff]  ;;  %v1494_v9 = vld [vmem:[%s152_s23 + $0x20] sm:$0xff]  ;;  %v1500_v12 = vld [vmem:[%s152_s23 + $0x38] sm:$0xff]  ;;  %vm309_vm1 = vcmask 31744   ;;  %s1306_s4 = smov 16  }
  0x58   : > { %v204_v10 = vsel %vm188_vm0, %v1492_v8, -inf  ;;  %v201_v11 = vsel %vm188_vm0, %v1494_v9, -inf  ;;  %v1502_v13 = vld [vmem:[%s152_s23 + $0x30] sm:$0xff]  ;;  %v210_v14 = vsel %vm188_vm0, %v1500_v12, -inf  ;;  %vm514_vm2 = vcmask 130048   ;;  %s176_s5 = scalar_lea.vmem [#allocation7], %s945_s29 }
  0x59   : > { %v207_v15 = vsel %vm188_vm0, %v1502_v13, -inf  ;;  %vm523_vm3 = vcmask 195584   ;;  %vm532_vm4 = vcmask 203776   ;;  %vm545_vm5 = vcmask 261120   ;;  %s854_s27 = sshll.u32 %s176_s5, 4  ;;  %s971_s22 = sshll.u32 %s1346_s13, 10  ;;  %s1676_s27 = int_to_ptr.vmem [resolvable:$true] %s854_s27 }
  0x5a   : > { %vm683_vm6 = vcmask 64512   ;;  %vm692_vm7 = vcmask 72704   ;;  %s1681_s6 = scalar_lea.hbm %s1726_s2, %s971_s22  ;;  %s841_s7 = scalar_lea.sflag [#allocation4], %s1462_s19 }
  0x5b   : > { %199 = vmax.xlane.f32.xlu1 %v198_v6  ;;  %193 = vmax.xlane.f32.xlu0 %v192_v7  ;;  %s1228_s20 = scalar_lea.vmem %s1676_s27, 1024  ;;  %s1307_s13 = smov [#allocation7]  }
  0x5c   : > { %p1229_p4 = scmp.ne.s32.totalorder %s1676_s27, %s1228_s20  ;;  %s1232_s18 = sshll.u32 %s1307_s13, 4  ;;  %s1233_s18 = int_to_ptr.vmem [resolvable:$false] %s1232_s18 }
  0x5d   : > { %s1234_s24 = scalar_lea.vmem %s1233_s18, 2048  ;;  %p1235_p11 = scmp.lt.s32.totalorder %s1676_s27, %s1233_s18 }
  0x5e   : > { %p1230_p6 = pnand %p1229_p4, %p1411_p12  ;;  %p1236_p13 = scmp.lt.s32.totalorder %s1234_s24, %s1228_s20 }
  0x5f   : > { %205 = vmax.xlane.f32.xlu1 %v204_v10  ;;  %202 = vmax.xlane.f32.xlu0 %v201_v11 }
  0x60   : > { %p1231_p8 = pneg %p1230_p6  ;;  %p1237_p3 = por %p1236_p13, %p1235_p11 }
  0x62   : > { %p1238_p7 = pnand %p1237_p3, %p1231_p8 }
  0x63   : > { %211 = vmax.xlane.f32.xlu1 %v210_v14  ;;  %208 = vmax.xlane.f32.xlu0 %v207_v15 }
  0x74   : > { %247 = vrot.lane.b32.xlu1 %v1486_v5, %s1304_s15 }
  0x78   : > { %249 = vrot.lane.b32.xlu1 %v1476_v0, %s1304_s15 }
  0x79   : > { %245 = vrot.lane.b32.xlu0 %v1478_v1, %s1304_s15 }
  0x7c   : > { %251 = vrot.lane.b32.xlu1 %v1480_v2, %s1304_s15 }
  0x7d   : > { %253 = vrot.lane.b32.xlu0 %v1494_v9, %s1304_s15 }
  0x80   : > { %255 = vrot.lane.b32.xlu1 %v1492_v8, %s1304_s15 }
  0x81   : > { %257 = vrot.lane.b32.xlu0 %v1502_v13, %s1304_s15 }
  0x84   : > { %259 = vrot.lane.b32.xlu1 %v1500_v12, %s1304_s15 }
  0xe4   : > { %v197_v16 = vpop.xlane.xlu1 %196  ;;  %v191_v17 = vpop.xlane.xlu0 %190 }
  0xe5   : > { %v215_v18 = vsub.f32 %v1476_v0, %v197_v16  ;;  %v213_v19 = vsub.f32 %v1478_v1, %v191_v17 }
  0xe7   : > { %v221_v20 = vmul.f32 1.442695, %v213_v19  ;;  %v225_v21 = vmul.f32 1.442695, %v215_v18 }
  0xe8   : > { %v200_v22 = vpop.xlane.xlu1 %199  ;;  %v194_v23 = vpop.xlane.xlu0 %193 }
  0xe9   : > { %v216_v24 = vsub.f32 %v1480_v2, %v200_v22  ;;  %v214_v25 = vsub.f32 %v1486_v5, %v194_v23  ;;  %1106 = vpow2.f32 %v221_v20 }
  0xea   : > { %1108 = vpow2.f32 %v225_v21 }
  0xeb   : > { %v223_v26 = vmul.f32 1.442695, %v214_v25  ;;  %v227_v27 = vmul.f32 1.442695, %v216_v24 }
  0xec   : > { %v206_v28 = vpop.xlane.xlu1 %205  ;;  %v203_v29 = vpop.xlane.xlu0 %202 }
  0xed   : > { %v218_v30 = vsub.f32 %v1492_v8, %v206_v28  ;;  %v217_v31 = vsub.f32 %v1494_v9, %v203_v29  ;;  %1110 = vpow2.f32 %v223_v26 }
  0xee   : > { %1112 = vpow2.f32 %v227_v27 }
  0xef   : > { %v229_v32 = vmul.f32 1.442695, %v217_v31  ;;  %v231_v33 = vmul.f32 1.442695, %v218_v30 }
  0xf0   : > { %v212_v34 = vpop.xlane.xlu1 %211  ;;  %v209_v35 = vpop.xlane.xlu0 %208 }
  0xf1   : > { %v220_v36 = vsub.f32 %v1500_v12, %v212_v34  ;;  %v219_v37 = vsub.f32 %v1502_v13, %v209_v35  ;;  %1114 = vpow2.f32 %v229_v32 }
  0xf2   : > { %1116 = vpow2.f32 %v231_v33 }
  0xf3   : > { %v233_v38 = vmul.f32 1.442695, %v219_v37  ;;  %v1107_v39 = vpop.eup %1106  ;;  %v235_v40 = vmul.f32 1.442695, %v220_v36 }
  0xf4   : > { %342 = vrot.lane.b32.xlu0 %v1107_v39, %s1305_s17  ;;  %v1109_v41 = vpop.eup %1108  ;;  %v248_v43 = vpop.permute.xlu1 %247 }
  0xf5   : > { %1118 = vpow2.f32 %v233_v38  ;;  %v246_v49 = vpop.permute.xlu0 %245 }
  0xf6   : > { %1120 = vpow2.f32 %v235_v40  ;;  %v269_v51 = vmul.f32 %v1107_v39, %v246_v49  ;;  %v541_v40 = vld [vmem:[#allocation5] sm:$0xff] }
  0xf7   : > { %v1111_v42 = vpop.eup %1110 }
  0xf8   : > { %346 = vrot.lane.b32.xlu0 %v1109_v41, %s1305_s17  ;;  %344 = vrot.lane.b32.xlu1 %v1111_v42, %s1305_s17  ;;  %v1113_v44 = vpop.eup %1112  ;;  %v250_v47 = vpop.permute.xlu1 %249  ;;  %v270_v54 = vmul.f32 %v1111_v42, %v248_v43 }
  0xf9   : > { %v254_v53 = vpop.permute.xlu0 %253  ;;  %v271_v55 = vmul.f32 %v1109_v41, %v250_v47  ;;  %v542_v41 = vld [vmem:[#allocation5 + $0x8] sm:$0xff] }
  0xfa   : > { %v1030_v42 = vpack.c.bf16 %v542_v41, %v541_v40  ;;  %v544_v40 = vld [vmem:[#allocation5 + $0x18] sm:$0xff] }
  0xfb   : > { %v1115_v45 = vpop.eup %1114 }
  0xfc   : > { %348 = vrot.lane.b32.xlu1 %v1113_v44, %s1305_s17  ;;  %350 = vrot.lane.b32.xlu0 %v1115_v45, %s1305_s17  ;;  %v1117_v46 = vpop.eup %1116  ;;  %v252_v52 = vpop.permute.xlu1 %251  ;;  %v273_v58 = vmul.f32 %v1115_v45, %v254_v53  ;;  %v948_v53 = vld [vmem:[#allocation5 + $0x30] ss:$0 sm:$0xff] }
  0xfd   : > { %v272_v57 = vmul.f32 %v1113_v44, %v252_v52  ;;  %v258_v59 = vpop.permute.xlu0 %257  ;;  %1031 = vmatprep.subr.bf16.mxu0 %v1030_v42 }
  0xfe   : > { %1033 = vmatpush3.bf16.msra.mxu0 %v1030_v42 }
  0xff   : > { %v1119_v48 = vpop.eup %1118 }
 0x100   : > { %352 = vrot.lane.b32.xlu1 %v1117_v46, %s1305_s17  ;;  %354 = vrot.lane.b32.xlu0 %v1119_v48, %s1305_s17  ;;  %v1121_v50 = vpop.eup %1120  ;;  %v256_v56 = vpop.permute.xlu1 %255  ;;  %v275_v61 = vmul.f32 %v1119_v48, %v258_v59 }
 0x101   : > { %v274_v60 = vmul.f32 %v1117_v46, %v256_v56 }
 0x104   : > { %356 = vrot.lane.b32.xlu1 %v1121_v50, %s1305_s17  ;;  %285 = vrot.lane.b32.xlu0 %v269_v51, %s1305_s17  ;;  %v260_v62 = vpop.permute.xlu1 %259 }
 0x105   : > { %v276_v63 = vmul.f32 %v1121_v50, %v260_v62 }
 0x108   : > { %287 = vrot.lane.b32.xlu1 %v270_v54, %s1305_s17  ;;  %289 = vrot.lane.b32.xlu0 %v271_v55, %s1305_s17 }
 0x10c   : > { %291 = vrot.lane.b32.xlu1 %v272_v57, %s1305_s17  ;;  %293 = vrot.lane.b32.xlu0 %v273_v58, %s1305_s17 }
 0x110   : > { %295 = vrot.lane.b32.xlu1 %v274_v60, %s1305_s17  ;;  %297 = vrot.lane.b32.xlu0 %v275_v61, %s1305_s17 }
 0x114   : > { %299 = vrot.lane.b32.xlu1 %v276_v63, %s1305_s17 }
 0x166   : > { %v343_v3 = vpop.permute.xlu0 %342 }
 0x167   : > { %v366_v4 = vsel %vm309_vm1, %v343_v3, 0.0 }
 0x168   : > { %367 = vadd.xlane.f32.xlu0 %v366_v4 }
 0x16a   : > { %v345_v6 = vpop.permute.xlu1 %344  ;;  %v347_v7 = vpop.permute.xlu0 %346 }
 0x16b   : > { %v369_v10 = vsel %vm309_vm1, %v345_v6, 0.0  ;;  %v372_v11 = vsel %vm309_vm1, %v347_v7, 0.0 }
 0x16c   : > { %370 = vadd.xlane.f32.xlu1 %v369_v10  ;;  %373 = vadd.xlane.f32.xlu0 %v372_v11 }
 0x16e   : > { %v349_v14 = vpop.permute.xlu1 %348  ;;  %v351_v15 = vpop.permute.xlu0 %350 }
 0x16f   : > { %v375_v16 = vsel %vm309_vm1, %v349_v14, 0.0  ;;  %v378_v17 = vsel %vm309_vm1, %v351_v15, 0.0 }
 0x170   : > { %376 = vadd.xlane.f32.xlu0 %v375_v16 }
 0x172   : > { %v353_v18 = vpop.permute.xlu1 %352  ;;  %v355_v19 = vpop.permute.xlu0 %354 }
 0x173   : > { %v381_v20 = vsel %vm309_vm1, %v353_v18, 0.0  ;;  %v384_v21 = vsel %vm309_vm1, %v355_v19, 0.0 }
 0x174   : > { %382 = vadd.xlane.f32.xlu1 %v381_v20  ;;  %379 = vadd.xlane.f32.xlu0 %v378_v17 }
 0x176   : > { %v357_v22 = vpop.permute.xlu1 %356  ;;  %v286_v23 = vpop.permute.xlu0 %285 }
 0x177   : > { %v387_v24 = vsel %vm309_vm1, %v357_v22, 0.0  ;;  %v310_v28 = vsel %vm309_vm1, %v286_v23, 0.0 }
 0x178   : > { %388 = vadd.xlane.f32.xlu1 %v387_v24  ;;  %385 = vadd.xlane.f32.xlu0 %v384_v21 }
 0x17a   : > { %v288_v25 = vpop.permute.xlu1 %287  ;;  %v290_v26 = vpop.permute.xlu0 %289 }
 0x17b   : > { %v313_v27 = vsel %vm309_vm1, %v288_v25, 0.0  ;;  %v316_v32 = vsel %vm309_vm1, %v290_v26, 0.0 }
 0x17c   : > { %314 = vadd.xlane.f32.xlu1 %v313_v27  ;;  %311 = vadd.xlane.f32.xlu0 %v310_v28 }
 0x17e   : > { %v292_v29 = vpop.permute.xlu1 %291  ;;  %v294_v30 = vpop.permute.xlu0 %293 }
 0x17f   : > { %v319_v31 = vsel %vm309_vm1, %v292_v29, 0.0  ;;  %v322_v35 = vsel %vm309_vm1, %v294_v30, 0.0 }
 0x180   : > { %320 = vadd.xlane.f32.xlu1 %v319_v31  ;;  %317 = vadd.xlane.f32.xlu0 %v316_v32 }
 0x182   : > { %v296_v33 = vpop.permute.xlu1 %295  ;;  %v298_v36 = vpop.permute.xlu0 %297 }
 0x183   : > { %v325_v34 = vsel %vm309_vm1, %v296_v33, 0.0  ;;  %v328_v39 = vsel %vm309_vm1, %v298_v36, 0.0 }
 0x184   : > { %326 = vadd.xlane.f32.xlu1 %v325_v34  ;;  %323 = vadd.xlane.f32.xlu0 %v322_v35 }
 0x186   : > { %v300_v37 = vpop.permute.xlu1 %299 }
 0x187   : > { %v331_v38 = vsel %vm309_vm1, %v300_v37, 0.0 }
 0x188   : > { %332 = vadd.xlane.f32.xlu1 %v331_v38  ;;  %329 = vadd.xlane.f32.xlu0 %v328_v39  ;;  %v543_v39 = vld [vmem:[#allocation5 + $0x10] sm:$0xff] }
 0x1f5   : > { %v368_v43 = vpop.xlane.xlu0 %367 }
 0x1f6   : > { %1122 = vrcp.f32 %v368_v43 }
 0x1f9   : > { %v374_v44 = vpop.xlane.xlu0 %373  ;;  %v371_v45 = vpop.xlane.xlu1 %370 }
 0x1fa   : > { %1124 = vrcp.f32 %v371_v45 }
 0x1fb   : > { %1126 = vrcp.f32 %v374_v44 }
 0x1fd   : > { %v377_v46 = vpop.xlane.xlu0 %376 }
 0x1fe   : > { %1128 = vrcp.f32 %v377_v46 }
 0x200   : > { %v1123_v51 = vpop.eup %1122 }
 0x201   : > { %v383_v47 = vpop.xlane.xlu1 %382  ;;  %v380_v48 = vpop.xlane.xlu0 %379 }
 0x202   : > { %1130 = vrcp.f32 %v383_v47  ;;  %v1034_v47 = vpack.c.bf16 %v544_v40, %v543_v39 }
 0x203   : > { %1132 = vrcp.f32 %v380_v48 }
 0x204   : > { %v1125_v52 = vpop.eup %1124  ;;  %1035 = vmatprep.subr.bf16.mxu0 %v1034_v47 }
 0x205   : > { %v389_v49 = vpop.xlane.xlu1 %388  ;;  %v386_v50 = vpop.xlane.xlu0 %385  ;;  %1037 = vmatpush3.bf16.msra.mxu0 %v1034_v47 }
 0x206   : > { %1134 = vrcp.f32 %v389_v49  ;;  %v1127_v58 = vpop.eup %1126 }
 0x207   : > { %1136 = vrcp.f32 %v386_v50 }
 0x208   : > { %v1129_v61 = vpop.eup %1128 }
 0x209   : > { %v315_v54 = vpop.xlane.xlu1 %314  ;;  %v312_v55 = vpop.xlane.xlu0 %311 }
 0x20a   : > { %v393_v56 = vmul.f32 %v1125_v52, %v315_v54  ;;  %v391_v57 = vmul.f32 %v1123_v51, %v312_v55 }
 0x20c   : > { %v1556_v59 = vmul.f32 %v948_v53, %v393_v56  ;;  %v1558_v60 = vmul.f32 %v948_v53, %v391_v57  ;;  %v1131_v10 = vpop.eup %1130 }
 0x20d   : > { %v321_v62 = vpop.xlane.xlu1 %320  ;;  %v318_v63 = vpop.xlane.xlu0 %317 }
 0x20e   : > { %v419_v3 = vmul.f32 %v1556_v59, %v1556_v59  ;;  %v1564_v4 = vmul.f32 %v1558_v60, %v1558_v60  ;;  %v397_v6 = vmul.f32 %v1129_v61, %v321_v62  ;;  %v395_v7 = vmul.f32 %v1127_v58, %v318_v63  ;;  %v1133_v16 = vpop.eup %1132 }
 0x210   : > { %v427_v11 = vadd.f32 1.0, %v419_v3  ;;  %v451_v14 = vadd.f32 1e-09, %v419_v3  ;;  %v426_v15 = vadd.f32 1.0, %v1564_v4  ;;  %v450_v17 = vadd.f32 1e-09, %v1564_v4  ;;  %v1135_v28 = vpop.eup %1134 }
 0x211   : > { %v1568_v18 = vmul.f32 %v948_v53, %v397_v6  ;;  %v1570_v19 = vmul.f32 %v948_v53, %v395_v7  ;;  %v327_v20 = vpop.xlane.xlu1 %326  ;;  %v324_v21 = vpop.xlane.xlu0 %323 }
 0x212   : > { %1138 = vrcp.f32 %v427_v11  ;;  %v401_v22 = vmul.f32 %v1131_v10, %v327_v20  ;;  %v399_v23 = vmul.f32 %v1133_v16, %v324_v21  ;;  %v1137_v33 = vpop.eup %1136 }
 0x213   : > { %1140 = vrsqrt.f32 %v451_v14  ;;  %v421_v24 = vmul.f32 %v1568_v18, %v1568_v18  ;;  %v420_v25 = vmul.f32 %v1570_v19, %v1570_v19 }
 0x214   : > { %1142 = vrcp.f32 %v426_v15  ;;  %v1576_v26 = vmul.f32 %v948_v53, %v401_v22  ;;  %v1578_v27 = vmul.f32 %v948_v53, %v399_v23 }
 0x215   : > { %1144 = vrsqrt.f32 %v450_v17  ;;  %v429_v29 = vadd.f32 1.0, %v421_v24  ;;  %v428_v30 = vadd.f32 1.0, %v420_v25  ;;  %v333_v31 = vpop.xlane.xlu1 %332  ;;  %v330_v32 = vpop.xlane.xlu0 %329  ;;  %v452_v34 = vadd.f32 1e-09, %v420_v25 }
 0x216   : > { %v423_v35 = vmul.f32 %v1576_v26, %v1576_v26  ;;  %v422_v36 = vmul.f32 %v1578_v27, %v1578_v27  ;;  %v405_v37 = vmul.f32 %v1135_v28, %v333_v31  ;;  %v403_v38 = vmul.f32 %v1137_v33, %v330_v32 }
 0x217   : > { %1146 = vrcp.f32 %v429_v29  ;;  %v453_v41 = vadd.f32 1e-09, %v421_v24 }
 0x218   : > { %v431_v42 = vadd.f32 1.0, %v423_v35  ;;  %1148 = vrcp.f32 %v428_v30  ;;  %v430_v43 = vadd.f32 1.0, %v422_v36  ;;  %v1584_v44 = vmul.f32 %v948_v53, %v405_v37 }
 0x219   : > { %v1586_v45 = vmul.f32 %v948_v53, %v403_v38  ;;  %1150 = vrsqrt.f32 %v452_v34  ;;  %v454_v46 = vadd.f32 1e-09, %v422_v36  ;;  %v455_v51 = vadd.f32 1e-09, %v423_v35 }
 0x21a   : > { %1152 = vrcp.f32 %v431_v42  ;;  %v425_v48 = vmul.f32 %v1584_v44, %v1584_v44 }
 0x21b   : > { %v424_v49 = vmul.f32 %v1586_v45, %v1586_v45  ;;  %1154 = vrsqrt.f32 %v453_v41 }
 0x21c   : > { %v1139_v50 = vpop.eup %1138  ;;  %1156 = vrcp.f32 %v430_v43  ;;  %v433_v54 = vadd.f32 1.0, %v425_v48  ;;  %v457_v6 = vadd.f32 1e-09, %v425_v48 }
 0x21d   : > { %v1141_v52 = vpop.eup %1140  ;;  %v432_v55 = vadd.f32 1.0, %v424_v49  ;;  %1158 = vrsqrt.f32 %v454_v46  ;;  %v437_v56 = vmul.f32 %v1139_v50, %v419_v3  ;;  %v456_v58 = vadd.f32 1e-09, %v424_v49 }
 0x21e   : > { %v1143_v53 = vpop.eup %1142  ;;  %1160 = vrcp.f32 %v433_v54 }
 0x21f   : > { %v1145_v57 = vpop.eup %1144  ;;  %v435_v61 = vmul.f32 %v1143_v53, %v1564_v4  ;;  %1162 = vrsqrt.f32 %v455_v51  ;;  %v467_v62 = vmul.f32 %v1141_v52, %v437_v56 }
 0x220   : > { %1164 = vrcp.f32 %v432_v55 }
 0x221   : > { %v1147_v63 = vpop.eup %1146  ;;  %v466_v7 = vmul.f32 %v1145_v57, %v435_v61  ;;  %v475_v10 = vmul.f32 %v467_v62, %v1556_v59  ;;  %1166 = vrsqrt.f32 %v456_v58 }
 0x222   : > { %v1149_v11 = vpop.eup %1148  ;;  %v441_v15 = vmul.f32 %v1147_v63, %v421_v24  ;;  %1168 = vrsqrt.f32 %v457_v6 }
 0x223   : > { %v474_v14 = vmul.f32 %v466_v7, %v1558_v60  ;;  %v1151_v16 = vpop.eup %1150  ;;  %492 = vrot.lane.b32.xlu1 %v475_v10, %s1306_s4  ;;  %v439_v3 = vmul.f32 %v1149_v11, %v420_v25  ;;  %v701_v10 = vld [vmem:[#allocation5 + $0x20] sm:$0xff]  ;;  %v702_v11 = vld [vmem:[#allocation5 + $0x28] sm:$0xff] }
 0x224   : > { %v1153_v17 = vpop.eup %1152 }
 0x225   : > { %490 = vrot.lane.b32.xlu0 %v474_v14, %s1306_s4  ;;  %v1155_v4 = vpop.eup %1154  ;;  %v468_v20 = vmul.f32 %v1151_v16, %v439_v3  ;;  %v445_v29 = vmul.f32 %v1153_v17, %v423_v35  ;;  %v1038_v14 = vpack.c.bf16 %v702_v11, %v701_v10 }
 0x226   : > { %v1157_v21 = vpop.eup %1156  ;;  %v469_v22 = vmul.f32 %v1155_v4, %v441_v15 }
 0x227   : > { %v1159_v23 = vpop.eup %1158  ;;  %v476_v59 = vmul.f32 %v468_v20, %v1570_v19  ;;  %v443_v28 = vmul.f32 %v1157_v21, %v422_v36  ;;  %1039 = vmatprep.subr.bf16.mxu1 %v1038_v14 }
 0x228   : > { %v1161_v60 = vpop.eup %1160  ;;  %v477_v25 = vmul.f32 %v469_v22, %v1568_v18  ;;  %1041 = vmatpush3.bf16.msra.mxu1 %v1038_v14 }
 0x229   : > { %v1163_v24 = vpop.eup %1162  ;;  %494 = vrot.lane.b32.xlu1 %v476_v59, %s1306_s4  ;;  %v470_v30 = vmul.f32 %v1159_v23, %v443_v28  ;;  %v449_v37 = vmul.f32 %v1161_v60, %v425_v48 }
 0x22a   : > { %v1165_v31 = vpop.eup %1164  ;;  %v471_v33 = vmul.f32 %v1163_v24, %v445_v29 }
 0x22b   : > { %v478_v32 = vmul.f32 %v470_v30, %v1578_v27  ;;  %v447_v34 = vmul.f32 %v1165_v31, %v424_v49  ;;  %v1167_v38 = vpop.eup %1166 }
 0x22c   : > { %v1169_v35 = vpop.eup %1168  ;;  %v479_v36 = vmul.f32 %v471_v33, %v1576_v26 }
 0x22d   : > { %496 = vrot.lane.b32.xlu1 %v477_v25, %s1306_s4  ;;  %498 = vrot.lane.b32.xlu0 %v478_v32, %s1306_s4  ;;  %v472_v19 = vmul.f32 %v1167_v38, %v447_v34  ;;  %v473_v40 = vmul.f32 %v1169_v35, %v449_v37 }
 0x22f   : > { %v480_v39 = vmul.f32 %v472_v19, %v1586_v45  ;;  %v481_v18 = vmul.f32 %v473_v40, %v1584_v44 }
 0x231   : > { %500 = vrot.lane.b32.xlu1 %v479_v36, %s1306_s4  ;;  %502 = vrot.lane.b32.xlu0 %v480_v39, %s1306_s4 }
 0x235   : > { %504 = vrot.lane.b32.xlu1 %v481_v18, %s1306_s4 }
 0x295   : > { %v493_v27 = vpop.permute.xlu1 %492 }
 0x296   : > { %v516_v41 = vsel %vm514_vm2, %v1486_v5, %v493_v27 }
 0x297   : > { %v491_v42 = vpop.permute.xlu0 %490  ;;  %v525_v26 = vsel %vm523_vm3, %v516_v41, 1.0 }
 0x298   : > { %v515_v43 = vsel %vm514_vm2, %v1478_v1, %v491_v42  ;;  %v534_v44 = vsel %vm532_vm4, %v525_v26, 0.0 }
 0x299   : > { %v524_v45 = vsel %vm523_vm3, %v515_v43, 1.0 }
 0x29a   : > { %v533_v46 = vsel %vm532_vm4, %v524_v45, 0.0 }
 0x29b   : > { %1002 = vmatprep.mubr.msk.f32.mxu0 %vm545_vm5, %v533_v46  ;;  %v495_v47 = vpop.permute.xlu1 %494 }
 0x29c   : > { %1003 = vmatmul.mubr.msk.f32.vlgmr.msra.gmra.mrb[0].mxu0 %vm545_vm5, %v534_v44  ;;  %v517_v5 = vsel %vm514_vm2, %v1476_v0, %v495_v47 }
 0x29d   : > { %v526_v48 = vsel %vm523_vm3, %v517_v5, 1.0 }
 0x29e   : > { %v535_v49 = vsel %vm532_vm4, %v526_v48, 0.0 }
 0x29f   : > { %v497_v1 = vpop.permute.xlu1 %496  ;;  %1005 = vmatprep.mubr.msk.f32.mxu0 %vm545_vm5, %v535_v49  ;;  %v499_v50 = vpop.permute.xlu0 %498 }
 0x2a0   : > { %v518_v51 = vsel %vm514_vm2, %v1480_v2, %v497_v1  ;;  %v519_v52 = vsel %vm514_vm2, %v1494_v9, %v499_v50 }
 0x2a1   : > { %v527_v54 = vsel %vm523_vm3, %v518_v51, 1.0  ;;  %v528_v55 = vsel %vm523_vm3, %v519_v52, 1.0 }
 0x2a2   : > { %v536_v0 = vsel %vm532_vm4, %v527_v54, 0.0  ;;  %v537_v53 = vsel %vm532_vm4, %v528_v55, 0.0 }
 0x2a3   : > { %v501_v56 = vpop.permute.xlu1 %500  ;;  %1006 = vmatmul.mubr.msk.f32.gmra.mrb[2].mxu0 %vm545_vm5, %v536_v0  ;;  %v503_v57 = vpop.permute.xlu0 %502 }
 0x2a4   : > { %v520_v58 = vsel %vm514_vm2, %v1492_v8, %v501_v56  ;;  %v521_v2 = vsel %vm514_vm2, %v1502_v13, %v503_v57  ;;  %1008 = vmatprep.mubr.msk.f32.mxu0 %vm545_vm5, %v537_v53 }
 0x2a5   : > { %v529_v9 = vsel %vm523_vm3, %v520_v58, 1.0  ;;  %v530_v61 = vsel %vm523_vm3, %v521_v2, 1.0 }
 0x2a6   : > { %v538_v62 = vsel %vm532_vm4, %v529_v9, 0.0  ;;  %v539_v63 = vsel %vm532_vm4, %v530_v61, 0.0 }
 0x2a7   : > { %v505_v6 = vpop.permute.xlu1 %504  ;;  %1009 = vmatmul.mubr.msk.f32.gmra.mrb[4].mxu0 %vm545_vm5, %v538_v62 }
 0x2a8   : > { %v522_v7 = vsel %vm514_vm2, %v1500_v12, %v505_v6  ;;  %1011 = vmatprep.mubr.msk.f32.mxu0 %vm545_vm5, %v539_v63 }
 0x2a9   : > { %v531_v8 = vsel %vm523_vm3, %v522_v7, 1.0 }
 0x2aa   : > { %v540_v13 = vsel %vm532_vm4, %v531_v8, 0.0 }
 0x2ab   : > { %1012 = vmatmul.mubr.msk.f32.gmra.mrb[6].mxu0 %vm545_vm5, %v540_v13 }
 0x36f   : > { %v1004_v15 = vpop.f32.mrb[0].mxu0 }
 0x370   : > { %v676_v16 = vmax.f32 %v1004_v15, 0.0  ;;  %v636_v3 = vpop.f32.mrb[1].mxu0 }
 0x371   : > { %v675_v17 = vmax.f32 %v636_v3, 0.0 }
 0x372   : > { %v685_v12 = vsel %vm683_vm6, %v676_v16, 1.0 }
 0x373   : > { %v684_v4 = vsel %vm683_vm6, %v675_v17, 1.0  ;;  %v694_v21 = vsel %vm692_vm7, %v685_v12, 0.0 }
 0x374   : > { %v693_v20 = vsel %vm692_vm7, %v684_v4, 0.0 }
 0x375   : > { %1018 = vmatprep.mubr.msk.f32.mxu1 %vm514_vm2, %v693_v20 }
 0x376   : > { %1019 = vmatmul.mubr.msk.f32.vlgmr.msra.gmra.mrb[0].mxu1 %vm514_vm2, %v694_v21  ;;  %v1007_v22 = vpop.f32.mrb[2].mxu0 }
 0x377   : > { %v678_v23 = vmax.f32 %v1007_v22, 0.0  ;;  %v646_v59 = vpop.f32.mrb[3].mxu0 }
 0x378   : > { %v677_v28 = vmax.f32 %v646_v59, 0.0 }
 0x379   : > { %v687_v29 = vsel %vm683_vm6, %v678_v23, 1.0 }
 0x37a   : > { %v686_v60 = vsel %vm683_vm6, %v677_v28, 1.0  ;;  %v1010_v24 = vpop.f32.mrb[4].mxu0  ;;  %v696_v33 = vsel %vm692_vm7, %v687_v29, 0.0 }
 0x37b   : > { %v680_v30 = vmax.f32 %v1010_v24, 0.0  ;;  %v656_v31 = vpop.f32.mrb[5].mxu0  ;;  %v695_v25 = vsel %vm692_vm7, %v686_v60, 0.0 }
 0x37c   : > { %v679_v32 = vmax.f32 %v656_v31, 0.0  ;;  %1021 = vmatprep.mubr.msk.f32.mxu1 %vm514_vm2, %v695_v25 }
 0x37d   : > { %v689_v34 = vsel %vm683_vm6, %v680_v30, 1.0  ;;  %1022 = vmatmul.mubr.msk.f32.gmra.mrb[2].mxu1 %vm514_vm2, %v696_v33 }
 0x37e   : > { %v688_v37 = vsel %vm683_vm6, %v679_v32, 1.0  ;;  %v1013_v38 = vpop.f32.mrb[6].mxu0  ;;  %v698_v40 = vsel %vm692_vm7, %v689_v34, 0.0 }
 0x37f   : > { %v682_v19 = vmax.f32 %v1013_v38, 0.0  ;;  %v666_v35 = vpop.f32.mrb[7].mxu0  ;;  %v697_v36 = vsel %vm692_vm7, %v688_v37, 0.0 }
 0x380   : > { %v681_v39 = vmax.f32 %v666_v35, 0.0  ;;  %1024 = vmatprep.mubr.msk.f32.mxu1 %vm514_vm2, %v697_v36 }
 0x381   : > { %v691_v18 = vsel %vm683_vm6, %v682_v19, 1.0  ;;  %1025 = vmatmul.mubr.msk.f32.gmra.mrb[4].mxu1 %vm514_vm2, %v698_v40 }
 0x382   : > { %v690_v27 = vsel %vm683_vm6, %v681_v39, 1.0  ;;  %v700_v42 = vsel %vm692_vm7, %v691_v18, 0.0 }
 0x383   : > { %v699_v41 = vsel %vm692_vm7, %v690_v27, 0.0 }
 0x384   : > { %1027 = vmatprep.mubr.msk.f32.mxu1 %vm514_vm2, %v699_v41 }
 0x385   : > { %1028 = vmatmul.mubr.msk.f32.gmra.mrb[6].mxu1 %vm514_vm2, %v700_v42 }
 0x449   : > { %v1020_v26 = vpop.f32.mrb[0].mxu1 }
 0x44a   : > { %833 = vst [vmem:[%s176_s5 + $0x8] sm:$0xff] %v1020_v26  ;;  %v793_v43 = vpop.f32.mrb[1].mxu1 }
 0x44b   : > { %832 = vst [vmem:[%s176_s5] sm:$0xff] %v793_v43 }
 0x450   : > { %v1023_v45 = vpop.f32.mrb[2].mxu1 }
 0x451   : > { %835 = vst [vmem:[%s176_s5 + $0x18] sm:$0xff] %v1023_v45  ;;  %v803_v44 = vpop.f32.mrb[3].mxu1 }
 0x452   : > { %834 = vst [vmem:[%s176_s5 + $0x10] sm:$0xff] %v803_v44 }
 0x454   : > { %v1026_v46 = vpop.f32.mrb[4].mxu1 }
 0x455   : > { %837 = vst [vmem:[%s176_s5 + $0x28] sm:$0xff] %v1026_v46  ;;  %v813_v47 = vpop.f32.mrb[5].mxu1 }
 0x456   : > { %836 = vst [vmem:[%s176_s5 + $0x20] sm:$0xff] %v813_v47 }
 0x458   : > { %v1029_v5 = vpop.f32.mrb[6].mxu1 }
 0x459   : > { %839 = vst [vmem:[%s176_s5 + $0x38] sm:$0xff] %v1029_v5  ;;  %v823_v48 = vpop.f32.mrb[7].mxu1 }
 0x45a   : > { %838 = vst [vmem:[%s176_s5 + $0x30] sm:$0xff] %v823_v48 }
 0x45b   : > { %1241 = shalt.err (!%p1238_p7)
}
 0x45c   : > { %s1242_s25 = scalar_lea.hbm %s1681_s6, 1024  ;;  %s1246_s30 = scalar_lea.hbm %s1726_s2, 4096 }
 0x45d   : > { %p1243_p9 = scmp.ne.s32.totalorder %s1681_s6, %s1242_s25  ;;  %p1247_p5 = scmp.lt.u32.totalorder %s1681_s6, %s1726_s2 }
 0x45e   : > { %p1248_p10 = scmp.lt.u32.totalorder %s1246_s30, %s1242_s25  ;;  %p1250_p4 = scmp.lt.u32.totalorder %s1242_s25, %s1681_s6 }
 0x45f   : > { %p1244_p1 = pnand %p1243_p9, %p1411_p12 }
 0x460   : > { %p1249_p2 = por %p1248_p10, %p1247_p5 }
 0x461   : > { %p1245_p0 = pneg %p1244_p1 }
 0x462   : > { %p1251_p6 = por %p1250_p4, %p1249_p2 }
 0x464   : > { %p1252_p8 = pnand %p1251_p6, %p1245_p0 }
 0x466   : > { %1255 = shalt.err (!%p1252_p8)
}
 0x467   : > { %s1308_s17 = smov 128   ;;  %s1309_s4 = smov 8  }
 0x468   : > { %1048 = dma.vmem_to_hbm [thread:$0]  (%p1411_p12), %s1676_s27, 1024, %s1681_s6, %s841_s7, %s1308_s17, %s1308_s17, %s1309_s4  }
 0x469 PF: > { %p1065_p11 = scmp.ge.s32.totalorder %s1298_s12, 2  ;;  %s869_s5 = sand.u32 1, %s1286_s9  }
 0x46a   : > { %p1741_p13 = scmp.ne.s32.totalorder %s1731_s16, 0  ;;  %s870_s22 = scalar_lea.sflag [#allocation4], %s869_s5 }
 0x46c   : > { %p1059_p3 = pnand %p1065_p11, %p1741_p13 }
 0x46e   : > { %1281 = dma.done.wait (!%p1059_p3), %s870_s22, 1024  }
 0x46f   : > { %1283 = vsyncadd (!%p1059_p3), %s870_s22, 4294966272  ;;  %p16_p7 = scmp.ge.s32.totalorder %s1378_s21, 6   ;;  %s1742_s9 = smov %s1290_s10 }
 0x470   : > { %s1743_s10 = smov %s1294_s11  ;;  %s1744_s11 = smov %s1407_s8 }
 0x471   : > { %s1745_s12 = smov %s1378_s21  ;;  %18 = sbr.rel (!%p16_p7) target bundleno = 6 (0x6), region = 77 }
 0x478   :  { %875 = vsyncpa [#allocation3], 1 }
 0x479   :  { %877 = vsyncpa [#allocation3 + $0x1], 1 }
 0x47a   :  { %878 = vsyncpa [#allocation6], 1 }
 0x47b   :  { %879 = vsyncpa [#allocation4], 1 }
 0x47c   :  { %881 = vsyncpa [#allocation4 + $0x1], 1 }

</bundles_post_ra>
